<compile_context>
chip_gen: v7x
topology: tpu7x:2x2x1
jax: 0.10.0
libtpu: 0.0.40
codegen_flags: <defaults>
</compile_context>

<pallas_src>
import math
import functools

import jax
import jax.numpy as jnp
from jax import lax
from jax.experimental import pallas as pl
from jax.experimental.pallas import tpu as pltpu

# Finite "-inf": exp(NEG_INF - m) underflows to exactly 0, no inf/NaN arithmetic anywhere.
NEG_INF = -1e30

# Re-derived VMEM budget: tiles here are small (<=256x256), but set an explicit scoped
# limit that fits inside v7x's 64 MiB physical VMEM (v5e/v6e have 128 MiB) with headroom.
VMEM_LIMIT_BYTES = 48 * 1024 * 1024


def _pick_tile(n: int, preferred: int, multiple: int) -> int:
    """Largest tile <= preferred that divides n and is a multiple of `multiple`.
    Falls back to the full dimension (always legal for BlockSpecs) if none exists."""
    if n <= preferred:
        return n
    t = (preferred // multiple) * multiple
    while t >= multiple:
        if n % t == 0:
            return t
        t -= multiple
    return n


# ---------------------------------------------------------------------------
# Kernel 1/3 and 3/3: bias-fused GEMM (used for both in- and out-projection).
# Activations are cast to the weight dtype (bf16 on the default path) inside the
# kernel; accumulation stays f32 via preferred_element_type.
# ---------------------------------------------------------------------------
def _linear_kernel(x_ref, w_ref, b_ref, o_ref):
    x = x_ref[...].astype(w_ref.dtype)
    acc = jnp.dot(x, w_ref[...], preferred_element_type=jnp.float32)
    o_ref[...] = (acc + b_ref[...].astype(jnp.float32)).astype(o_ref.dtype)


def _linear(x2d, w_t, b, out_dtype):
    M, K = x2d.shape
    Kw, N = w_t.shape
    assert K == Kw
    tm = _pick_tile(M, 512, 8)     # sublane dim: multiple of 8 (or full)
    tn = _pick_tile(N, 512, 128)   # lane dim: multiple of 128 (or full) -> unmasked stores
    return pl.pallas_call(
        _linear_kernel,
        out_shape=jax.ShapeDtypeStruct((M, N), out_dtype),
        grid_spec=pltpu.PrefetchScalarGridSpec(
            num_scalar_prefetch=0,
            grid=(M // tm, N // tn),
            in_specs=[
                pl.BlockSpec((tm, K), lambda i, j: (i, 0)),
                pl.BlockSpec((K, tn), lambda i, j: (0, j)),
                pl.BlockSpec((1, tn), lambda i, j: (0, j)),
            ],
            out_specs=pl.BlockSpec((tm, tn), lambda i, j: (i, j)),
        ),
        compiler_params=pltpu.CompilerParams(
            dimension_semantics=("parallel", "parallel"),
            vmem_limit_bytes=VMEM_LIMIT_BYTES),
    )(x2d, w_t, b.reshape(1, N))


# ---------------------------------------------------------------------------
# Kernel 2/3: flash-style attention.
#   grid = (B*H, S/TQ, S/TKV); KV axis is the innermost "arbitrary" reduction axis;
#   the output block is resident across it and finalized on the last KV step.
# ---------------------------------------------------------------------------
def _flash_kernel(q_ref, k_ref, v_ref, o_ref, m_ref, l_ref, acc_ref,
                  *, tq, tkv, causal, approx_recip):
    qi = pl.program_id(1)
    ki = pl.program_id(2)

    @pl.when(ki == 0)
    def _init():
        m_ref[...] = jnp.full(m_ref.shape, NEG_INF, dtype=m_ref.dtype)
        l_ref[...] = jnp.zeros(l_ref.shape, dtype=l_ref.dtype)
        acc_ref[...] = jnp.zeros(acc_ref.shape, dtype=acc_ref.dtype)

    def _step():
        q = q_ref[0]          # (TQ, d_head) — already pre-scaled by 1/sqrt(d_head)
        k = k_ref[0]          # (TKV, d_head)
        # scores = q @ k^T on the MXU, f32 accumulation.
        s = lax.dot_general(q, k, (((1,), (1,)), ((), ())),
                            preferred_element_type=jnp.float32)      # (TQ, TKV)
        if causal:
            q_pos = qi * tq + lax.broadcasted_iota(jnp.int32, (tq, tkv), 0)
            k_pos = ki * tkv + lax.broadcasted_iota(jnp.int32, (tq, tkv), 1)
            s = jnp.where(k_pos > q_pos, NEG_INF, s)

        m_prev = m_ref[...]
        m_new = jnp.maximum(m_prev, jnp.max(s, axis=-1, keepdims=True))
        alpha = jnp.exp(m_prev - m_new)
        p = jnp.exp(s - m_new)
        l_ref[...] = alpha * l_ref[...] + jnp.sum(p, axis=-1, keepdims=True)
        acc_ref[...] = alpha * acc_ref[...] + jnp.dot(
            p.astype(v_ref.dtype), v_ref[0], preferred_element_type=jnp.float32)
        m_ref[...] = m_new

    if causal:
        # Skip compute for KV tiles lying entirely above the diagonal.
        # (KV tile 0 is never skipped, so every query row sees >=1 key before finalize.)
        @pl.when(ki * tkv <= qi * tq + (tq - 1))
        def _():
            _step()
    else:
        _step()

    @pl.when(ki == pl.num_programs(2) - 1)
    def _finalize():
        inv_l = pl.reciprocal(l_ref[...], approx=approx_recip)  # EUP vrcp when approx
        o_ref[0] = (acc_ref[...] * inv_l).astype(o_ref.dtype)


def _flash_attention(q, k, v, *, causal, approx_recip):
    BH, S, d_head = q.shape
    tq = _pick_tile(S, 256, 128)
    tkv = _pick_tile(S, 256, 128)
    kernel = functools.partial(_flash_kernel, tq=tq, tkv=tkv,
                               causal=causal, approx_recip=approx_recip)
    return pl.pallas_call(
        kernel,
        out_shape=jax.ShapeDtypeStruct((BH, S, d_head), q.dtype),
        grid_spec=pltpu.PrefetchScalarGridSpec(
            num_scalar_prefetch=0,
            grid=(BH, S // tq, S // tkv),
            in_specs=[
                pl.BlockSpec((1, tq, d_head), lambda b, i, j: (b, i, 0)),
                pl.BlockSpec((1, tkv, d_head), lambda b, i, j: (b, j, 0)),
                pl.BlockSpec((1, tkv, d_head), lambda b, i, j: (b, j, 0)),
            ],
            out_specs=pl.BlockSpec((1, tq, d_head), lambda b, i, j: (b, i, 0)),
            scratch_shapes=[
                pltpu.VMEM((tq, 1), jnp.float32),       # running max  m
                pltpu.VMEM((tq, 1), jnp.float32),       # running sum  l
                pltpu.VMEM((tq, d_head), jnp.float32),  # f32 output accumulator
            ],
        ),
        compiler_params=pltpu.CompilerParams(
            dimension_semantics=("parallel", "parallel", "arbitrary"),
            vmem_limit_bytes=VMEM_LIMIT_BYTES),
    )(q, k, v)


# ---------------------------------------------------------------------------
# Public wrapper — mirrors SelfAttention.forward(x, causal_mask).
#   x: (B, S, D) f32; w_in_t: (D, 3D); b_in: (3D,); w_out_t: (D, D); b_out: (D,)
#   (weights stored transposed relative to torch.nn.Linear so y = x @ W^T + b).
# ---------------------------------------------------------------------------
@functools.partial(jax.jit, static_argnames=("n_heads", "causal_mask", "compute_dtype"))
def self_attention(x, w_in_t, b_in, w_out_t, b_out, *, n_heads,
                   causal_mask=False, compute_dtype=jnp.bfloat16):
    B, S, D = x.shape
    assert D % n_heads == 0, "d_embed must be divisible by n_heads"
    H = n_heads
    d_head = D // H

    # Fold 1/sqrt(d_head) into the Q columns of the in-projection (weights + bias).
    scale = 1.0 / math.sqrt(d_head)
    col_scale = jnp.concatenate([jnp.full((D,), scale, dtype=jnp.float32),
                                 jnp.ones((2 * D,), dtype=jnp.float32)])
    w_in_c = (w_in_t.astype(jnp.float32) * col_scale[None, :]).astype(compute_dtype)
    b_in_c = b_in.astype(jnp.float32) * col_scale
    w_out_c = w_out_t.astype(compute_dtype)   # resident weights in compute dtype
    b_out_c = b_out.astype(jnp.float32)

    # 1) in-projection; qkv written in compute dtype (halves HBM traffic on bf16 path).
    qkv = _linear(x.reshape(B * S, D), w_in_c, b_in_c, out_dtype=compute_dtype)

    # 2) layout plumbing outside the kernels: (B*S, 3D) -> 3 x (B*H, S, d_head).
    qkv = qkv.reshape(B, S, 3, H, d_head).transpose(2, 0, 3, 1, 4)   # (3, B, H, S, dh)
    q = qkv[0].reshape(B * H, S, d_head)
    k = qkv[1].reshape(B * H, S, d_head)
    v = qkv[2].reshape(B * H, S, d_head)

    # 3) flash attention (exact reciprocal only on the f32 verification path).
    o = _flash_attention(q, k, v, causal=causal_mask,
                         approx_recip=(compute_dtype != jnp.float32))

    # 4) merge heads back (wrapper-side "concat"): (B*H, S, dh) -> (B*S, D).
    o = o.reshape(B, H, S, d_head).transpose(0, 2, 1, 3).reshape(B * S, D)

    # 5) out-projection back to the input dtype.
    out = _linear(o, w_out_c, b_out_c, out_dtype=x.dtype)
    return out.reshape(B, S, D)


# ---------------------------------------------------------------------------
# Pure-JAX f32 reference mirroring the PyTorch forward.
# ---------------------------------------------------------------------------
def _reference(x, w_in_t, b_in, w_out_t, b_out, n_heads, causal_mask):
    P = lax.Precision.HIGHEST
    B, S, D = x.shape
    d_head = D // n_heads
    qkv = jnp.dot(x, w_in_t, precision=P) + b_in
    q, k, v = jnp.split(qkv, 3, axis=-1)

    def heads(t):
        return t.reshape(B, S, n_heads, d_head).transpose(0, 2, 1, 3)

    q, k, v = heads(q), heads(k), heads(v)
    w = jnp.einsum('bhqd,bhkd->bhqk', q, k, precision=P)
    if causal_mask:
        row = jnp.arange(S)[:, None]
        col = jnp.arange(S)[None, :]
        w = jnp.where(col > row, -jnp.inf, w)
    w = w / math.sqrt(d_head)
    w = jax.nn.softmax(w, axis=-1)
    o = jnp.einsum('bhqk,bhkd->bhqd', w, v, precision=P)
    o = o.transpose(0, 2, 1, 3).reshape(B, S, D)
    return jnp.dot(o, w_out_t, precision=P) + b_out


def _max_err(a, b):
    a = jnp.asarray(a, jnp.float32)
    b = jnp.asarray(b, jnp.float32)
    return float(jnp.max(jnp.abs(a - b)) / (jnp.max(jnp.abs(b)) + 1e-6))


if __name__ == "__main__":
    cases = [
        dict(B=2, S=8, D=32, H=4),      # small shape consistent with the module
        dict(B=1, S=512, D=128, H=4),   # exercises 256-wide q/kv tiles + causal skipping
    ]
    for c in cases:
        B, S, D, H = c["B"], c["S"], c["D"], c["H"]
        key = jax.random.PRNGKey(0)
        kx, kwi, kbi, kwo, kbo = jax.random.split(key, 5)
        x = jax.random.normal(kx, (B, S, D), dtype=jnp.float32)
        w_in_t = jax.random.normal(kwi, (D, 3 * D), dtype=jnp.float32) / math.sqrt(D)
        b_in = jax.random.normal(kbi, (3 * D,), dtype=jnp.float32) * 0.01
        w_out_t = jax.random.normal(kwo, (D, D), dtype=jnp.float32) / math.sqrt(D)
        b_out = jax.random.normal(kbo, (D,), dtype=jnp.float32) * 0.01

        for causal in (False, True):
            ref = _reference(x, w_in_t, b_in, w_out_t, b_out, H, causal)

            # f32 compute path: tight semantic check vs. the f32 reference.
            out32 = self_attention(x, w_in_t, b_in, w_out_t, b_out, n_heads=H,
                                   causal_mask=causal, compute_dtype=jnp.float32)
            out32 = jax.block_until_ready(out32)
            assert out32.shape == (B, S, D)
            e32 = _max_err(out32, ref)
            assert e32 < 1e-3, f"f32 path mismatch (case={c}, causal={causal}, err={e32})"

            # default bf16-MXU path (performance config): looser tolerance.
            out16 = self_attention(x, w_in_t, b_in, w_out_t, b_out, n_heads=H,
                                   causal_mask=causal, compute_dtype=jnp.bfloat16)
            out16 = jax.block_until_ready(out16)
            e16 = _max_err(out16, ref)
            assert e16 < 4e-2, f"bf16 path mismatch (case={c}, causal={causal}, err={e16})"

    print("KERNEL_OK")
</pallas_src>

<mosaic_0001>
module attributes {stable_mosaic.version = 11 : i64} {
  func.func @_linear_kernel(%arg0: i32, %arg1: i32, %arg2: memref<16x32xf32, #tpu.memory_space<vmem>>, %arg3: memref<32x96xf32, #tpu.memory_space<vmem>>, %arg4: memref<1x96xf32, #tpu.memory_space<vmem>>, %arg5: memref<16x96xf32, #tpu.memory_space<vmem>>) attributes {dimension_semantics = [#tpu.dimension_semantics<parallel>, #tpu.dimension_semantics<parallel>], iteration_bounds = array<i64: 1, 1>, scalar_prefetch = 0 : i64, scratch_operands = 0 : i64, tpu.core_type = #tpu.core_type<tc>, window_params = [{transform_indices = @transform_0, window_bounds = array<i64: 16, 32>}, {transform_indices = @transform_1, window_bounds = array<i64: 32, 96>}, {transform_indices = @transform_2, window_bounds = array<i64: 1, 96>}, {transform_indices = @transform_3, window_bounds = array<i64: 16, 96>}]} {
    %c0 = arith.constant 0 : index
    %c0_0 = arith.constant 0 : index
    %0 = vector.load %arg2[%c0, %c0_0] : memref<16x32xf32, #tpu.memory_space<vmem>>, vector<16x32xf32>
    %c0_1 = arith.constant 0 : index
    %c0_2 = arith.constant 0 : index
    %1 = vector.load %arg3[%c0_1, %c0_2] : memref<32x96xf32, #tpu.memory_space<vmem>>, vector<32x96xf32>
    %cst = arith.constant dense<0.000000e+00> : vector<16x96xf32>
    %2 = tpu.matmul %0, %1, %cst {dimension_numbers = #tpu.dot_dimension_numbers<[1], [0], [0], [1], [0, 0, 1, 1], [], []>} : vector<16x32xf32>, vector<32x96xf32>, vector<16x96xf32> -> vector<16x96xf32>
    %c0_3 = arith.constant 0 : index
    %c0_4 = arith.constant 0 : index
    %3 = vector.load %arg4[%c0_3, %c0_4] : memref<1x96xf32, #tpu.memory_space<vmem>>, vector<1x96xf32>
    %4 = vector.broadcast %3 : vector<1x96xf32> to vector<16x96xf32>
    %5 = arith.addf %2, %4 : vector<16x96xf32>
    %c0_5 = arith.constant 0 : index
    %c0_6 = arith.constant 0 : index
    %6 = vector.load %arg5[%c0_5, %c0_6] : memref<16x96xf32, #tpu.memory_space<vmem>>, vector<16x96xf32>
    tpu.vector_store %arg5[%c0_5, %c0_6], %5 {strides = array<i32>} : memref<16x96xf32, #tpu.memory_space<vmem>>, vector<16x96xf32>,
    return
  }
  func.func @transform_0(%arg0: i32, %arg1: i32) -> (i32, i32) {
    %c0_i32 = arith.constant 0 : i32
    %c0_i32_0 = arith.constant 0 : i32
    return %arg0, %c0_i32 : i32, i32
  }
  func.func @transform_1(%arg0: i32, %arg1: i32) -> (i32, i32) {
    %c0_i32 = arith.constant 0 : i32
    %c0_i32_0 = arith.constant 0 : i32
    return %c0_i32, %arg1 : i32, i32
  }
  func.func @transform_2(%arg0: i32, %arg1: i32) -> (i32, i32) {
    %c0_i32 = arith.constant 0 : i32
    %c0_i32_0 = arith.constant 0 : i32
    return %c0_i32, %arg1 : i32, i32
  }
  func.func @transform_3(%arg0: i32, %arg1: i32) -> (i32, i32) {
    %c0_i32 = arith.constant 0 : i32
    return %arg0, %arg1 : i32, i32
  }
}

module attributes {stable_mosaic.version = 11 : i64} {
  func.func @_flash_kernel(%arg0: i32, %arg1: i32, %arg2: i32, %arg3: memref<1x8x8xf32, #tpu.memory_space<vmem>>, %arg4: memref<1x8x8xf32, #tpu.memory_space<vmem>>, %arg5: memref<1x8x8xf32, #tpu.memory_space<vmem>>, %arg6: memref<1x8x8xf32, #tpu.memory_space<vmem>>, %arg7: memref<8x1xf32, #tpu.memory_space<vmem>>, %arg8: memref<8x1xf32, #tpu.memory_space<vmem>>, %arg9: memref<8x8xf32, #tpu.memory_space<vmem>>) attributes {dimension_semantics = [#tpu.dimension_semantics<parallel>, #tpu.dimension_semantics<parallel>, #tpu.dimension_semantics<arbitrary>], iteration_bounds = array<i64: 8, 1, 1>, scalar_prefetch = 0 : i64, scratch_operands = 3 : i64, tpu.core_type = #tpu.core_type<tc>, window_params = [{transform_indices = @transform_0, window_bounds = array<i64: 1, 8, 8>}, {transform_indices = @transform_1, window_bounds = array<i64: 1, 8, 8>}, {transform_indices = @transform_2, window_bounds = array<i64: 1, 8, 8>}, {transform_indices = @transform_3, window_bounds = array<i64: 1, 8, 8>}]} {
    %c0_i32 = arith.constant 0 : i32
    %0 = arith.cmpi eq, %arg2, %c0_i32 : i32
    %1 = arith.extui %0 : i1 to i32
    %c0_i32_0 = arith.constant 0 : i32
    %2 = arith.cmpi ne, %1, %c0_i32_0 : i32
    scf.if %2 {
      %cst_26 = arith.constant -1.000000e+30 : f32
      %35 = vector.broadcast %cst_26 : f32 to vector<8x1xf32>
      %c0_27 = arith.constant 0 : index
      %c0_28 = arith.constant 0 : index
      %36 = vector.load %arg7[%c0_27, %c0_28] : memref<8x1xf32, #tpu.memory_space<vmem>>, vector<8x1xf32>
      tpu.vector_store %arg7[%c0_27, %c0_28], %35 {strides = array<i32>} : memref<8x1xf32, #tpu.memory_space<vmem>>, vector<8x1xf32>,
      %cst_29 = arith.constant 0.000000e+00 : f32
      %37 = vector.broadcast %cst_29 : f32 to vector<8x1xf32>
      %c0_30 = arith.constant 0 : index
      %c0_31 = arith.constant 0 : index
      %38 = vector.load %arg8[%c0_30, %c0_31] : memref<8x1xf32, #tpu.memory_space<vmem>>, vector<8x1xf32>
      tpu.vector_store %arg8[%c0_30, %c0_31], %37 {strides = array<i32>} : memref<8x1xf32, #tpu.memory_space<vmem>>, vector<8x1xf32>,
      %cst_32 = arith.constant 0.000000e+00 : f32
      %39 = vector.broadcast %cst_32 : f32 to vector<8x8xf32>
      %c0_33 = arith.constant 0 : index
      %c0_34 = arith.constant 0 : index
      %40 = vector.load %arg9[%c0_33, %c0_34] : memref<8x8xf32, #tpu.memory_space<vmem>>, vector<8x8xf32>
      tpu.vector_store %arg9[%c0_33, %c0_34], %39 {strides = array<i32>} : memref<8x8xf32, #tpu.memory_space<vmem>>, vector<8x8xf32>,
    } else {
    }
    %c0 = arith.constant 0 : index
    %c0_1 = arith.constant 0 : index
    %c0_2 = arith.constant 0 : index
    %3 = vector.load %arg3[%c0, %c0_1, %c0_2] : memref<1x8x8xf32, #tpu.memory_space<vmem>>, vector<1x8x8xf32>
    %4 = vector.shape_cast %3 : vector<1x8x8xf32> to vector<8x8xf32>
    %c0_3 = arith.constant 0 : index
    %c0_4 = arith.constant 0 : index
    %c0_5 = arith.constant 0 : index
    %5 = vector.load %arg4[%c0_3, %c0_4, %c0_5] : memref<1x8x8xf32, #tpu.memory_space<vmem>>, vector<1x8x8xf32>
    %6 = vector.shape_cast %5 : vector<1x8x8xf32> to vector<8x8xf32>
    %cst = arith.constant dense<0.000000e+00> : vector<8x8xf32>
    %7 = tpu.matmul %4, %6, %cst {dimension_numbers = #tpu.dot_dimension_numbers<[1], [1], [0], [0], [0, 0, 1, 0], [], []>} : vector<8x8xf32>, vector<8x8xf32>, vector<8x8xf32> -> vector<8x8xf32>
    %c0_6 = arith.constant 0 : index
    %c0_7 = arith.constant 0 : index
    %8 = vector.load %arg7[%c0_6, %c0_7] : memref<8x1xf32, #tpu.memory_space<vmem>>, vector<8x1xf32>
    %cst_8 = arith.constant dense<0xFF800000> : vector<8xf32>
    %9 = vector.multi_reduction <maximumf>, %7, %cst_8 [1] : vector<8x8xf32> to vector<8xf32>
    %10 = vector.shape_cast %9 : vector<8xf32> to vector<8x1xf32>
    %11 = arith.maximumf %8, %10 : vector<8x1xf32>
    %12 = arith.subf %8, %11 : vector<8x1xf32>
    %13 = math.exp %12 : vector<8x1xf32>
    %14 = vector.broadcast %11 : vector<8x1xf32> to vector<8x8xf32>
    %15 = arith.subf %7, %14 : vector<8x8xf32>
    %16 = math.exp %15 : vector<8x8xf32>
    %c0_9 = arith.constant 0 : index
    %c0_10 = arith.constant 0 : index
    %17 = vector.load %arg8[%c0_9, %c0_10] : memref<8x1xf32, #tpu.memory_space<vmem>>, vector<8x1xf32>
    %18 = arith.mulf %13, %17 : vector<8x1xf32>
    %cst_11 = arith.constant dense<0.000000e+00> : vector<8xf32>
    %19 = vector.multi_reduction <add>, %16, %cst_11 [1] : vector<8x8xf32> to vector<8xf32>
    %20 = vector.shape_cast %19 : vector<8xf32> to vector<8x1xf32>
    %21 = arith.addf %18, %20 : vector<8x1xf32>
    %c0_12 = arith.constant 0 : index
    %c0_13 = arith.constant 0 : index
    %22 = vector.load %arg8[%c0_12, %c0_13] : memref<8x1xf32, #tpu.memory_space<vmem>>, vector<8x1xf32>
    tpu.vector_store %arg8[%c0_12, %c0_13], %21 {strides = array<i32>} : memref<8x1xf32, #tpu.memory_space<vmem>>, vector<8x1xf32>,
    %c0_14 = arith.constant 0 : index
    %c0_15 = arith.constant 0 : index
    %23 = vector.load %arg9[%c0_14, %c0_15] : memref<8x8xf32, #tpu.memory_space<vmem>>, vector<8x8xf32>
    %24 = vector.broadcast %13 : vector<8x1xf32> to vector<8x8xf32>
    %25 = arith.mulf %24, %23 : vector<8x8xf32>
    %c0_16 = arith.constant 0 : index
    %c0_17 = arith.constant 0 : index
    %c0_18 = arith.constant 0 : index
    %26 = vector.load %arg5[%c0_16, %c0_17, %c0_18] : memref<1x8x8xf32, #tpu.memory_space<vmem>>, vector<1x8x8xf32>
    %27 = vector.shape_cast %26 : vector<1x8x8xf32> to vector<8x8xf32>
    %cst_19 = arith.constant dense<0.000000e+00> : vector<8x8xf32>
    %28 = tpu.matmul %16, %27, %cst_19 {dimension_numbers = #tpu.dot_dimension_numbers<[1], [0], [0], [1], [0, 0, 1, 1], [], []>} : vector<8x8xf32>, vector<8x8xf32>, vector<8x8xf32> -> vector<8x8xf32>
    %29 = arith.addf %25, %28 : vector<8x8xf32>
    %c0_20 = arith.constant 0 : index
    %c0_21 = arith.constant 0 : index
    %30 = vector.load %arg9[%c0_20, %c0_21] : memref<8x8xf32, #tpu.memory_space<vmem>>, vector<8x8xf32>
    tpu.vector_store %arg9[%c0_20, %c0_21], %29 {strides = array<i32>} : memref<8x8xf32, #tpu.memory_space<vmem>>, vector<8x8xf32>,
    %c0_22 = arith.constant 0 : index
    %c0_23 = arith.constant 0 : index
    %31 = vector.load %arg7[%c0_22, %c0_23] : memref<8x1xf32, #tpu.memory_space<vmem>>, vector<8x1xf32>
    tpu.vector_store %arg7[%c0_22, %c0_23], %11 {strides = array<i32>} : memref<8x1xf32, #tpu.memory_space<vmem>>, vector<8x1xf32>,
    %c0_i32_24 = arith.constant 0 : i32
    %32 = arith.cmpi eq, %arg2, %c0_i32_24 : i32
    %33 = arith.extui %32 : i1 to i32
    %c0_i32_25 = arith.constant 0 : i32
    %34 = arith.cmpi ne, %33, %c0_i32_25 : i32
    scf.if %34 {
      %c0_26 = arith.constant 0 : index
      %c0_27 = arith.constant 0 : index
      %35 = vector.load %arg8[%c0_26, %c0_27] : memref<8x1xf32, #tpu.memory_space<vmem>>, vector<8x1xf32>
      %36 = tpu.reciprocal %35 : vector<8x1xf32> -> vector<8x1xf32>
      %c0_28 = arith.constant 0 : index
      %c0_29 = arith.constant 0 : index
      %37 = vector.load %arg9[%c0_28, %c0_29] : memref<8x8xf32, #tpu.memory_space<vmem>>, vector<8x8xf32>
      %38 = vector.broadcast %36 : vector<8x1xf32> to vector<8x8xf32>
      %39 = arith.mulf %37, %38 : vector<8x8xf32>
      %c0_30 = arith.constant 0 : index
      %c0_31 = arith.constant 0 : index
      %c0_32 = arith.constant 0 : index
      %40 = vector.load %arg6[%c0_30, %c0_31, %c0_32] : memref<1x8x8xf32, #tpu.memory_space<vmem>>, vector<1x8x8xf32>
      %41 = vector.shape_cast %40 : vector<1x8x8xf32> to vector<8x8xf32>
      %42 = vector.shape_cast %39 : vector<8x8xf32> to vector<1x8x8xf32>
      tpu.vector_store %arg6[%c0_30, %c0_31, %c0_32], %42 {strides = array<i32>} : memref<1x8x8xf32, #tpu.memory_space<vmem>>, vector<1x8x8xf32>,
    } else {
    }
    return
  }
  func.func @transform_0(%arg0: i32, %arg1: i32, %arg2: i32) -> (i32, i32, i32) {
    %c0_i32 = arith.constant 0 : i32
    %c0_i32_0 = arith.constant 0 : i32
    return %arg0, %arg1, %c0_i32 : i32, i32, i32
  }
  func.func @transform_1(%arg0: i32, %arg1: i32, %arg2: i32) -> (i32, i32, i32) {
    %c0_i32 = arith.constant 0 : i32
    %c0_i32_0 = arith.constant 0 : i32
    return %arg0, %arg2, %c0_i32 : i32, i32, i32
  }
  func.func @transform_2(%arg0: i32, %arg1: i32, %arg2: i32) -> (i32, i32, i32) {
    %c0_i32 = arith.constant 0 : i32
    %c0_i32_0 = arith.constant 0 : i32
    return %arg0, %arg2, %c0_i32 : i32, i32, i32
  }
  func.func @transform_3(%arg0: i32, %arg1: i32, %arg2: i32) -> (i32, i32, i32) {
    %c0_i32 = arith.constant 0 : i32
    %c0_i32_0 = arith.constant 0 : i32
    return %arg0, %arg1, %c0_i32 : i32, i32, i32
  }
}

module attributes {stable_mosaic.version = 11 : i64} {
  func.func @_linear_kernel(%arg0: i32, %arg1: i32, %arg2: memref<16x32xf32, #tpu.memory_space<vmem>>, %arg3: memref<32x32xf32, #tpu.memory_space<vmem>>, %arg4: memref<1x32xf32, #tpu.memory_space<vmem>>, %arg5: memref<16x32xf32, #tpu.memory_space<vmem>>) attributes {dimension_semantics = [#tpu.dimension_semantics<parallel>, #tpu.dimension_semantics<parallel>], iteration_bounds = array<i64: 1, 1>, scalar_prefetch = 0 : i64, scratch_operands = 0 : i64, tpu.core_type = #tpu.core_type<tc>, window_params = [{transform_indices = @transform_0, window_bounds = array<i64: 16, 32>}, {transform_indices = @transform_1, window_bounds = array<i64: 32, 32>}, {transform_indices = @transform_2, window_bounds = array<i64: 1, 32>}, {transform_indices = @transform_3, window_bounds = array<i64: 16, 32>}]} {
    %c0 = arith.constant 0 : index
    %c0_0 = arith.constant 0 : index
    %0 = vector.load %arg2[%c0, %c0_0] : memref<16x32xf32, #tpu.memory_space<vmem>>, vector<16x32xf32>
    %c0_1 = arith.constant 0 : index
    %c0_2 = arith.constant 0 : index
    %1 = vector.load %arg3[%c0_1, %c0_2] : memref<32x32xf32, #tpu.memory_space<vmem>>, vector<32x32xf32>
    %cst = arith.constant dense<0.000000e+00> : vector<16x32xf32>
    %2 = tpu.matmul %0, %1, %cst {dimension_numbers = #tpu.dot_dimension_numbers<[1], [0], [0], [1], [0, 0, 1, 1], [], []>} : vector<16x32xf32>, vector<32x32xf32>, vector<16x32xf32> -> vector<16x32xf32>
    %c0_3 = arith.constant 0 : index
    %c0_4 = arith.constant 0 : index
    %3 = vector.load %arg4[%c0_3, %c0_4] : memref<1x32xf32, #tpu.memory_space<vmem>>, vector<1x32xf32>
    %4 = vector.broadcast %3 : vector<1x32xf32> to vector<16x32xf32>
    %5 = arith.addf %2, %4 : vector<16x32xf32>
    %c0_5 = arith.constant 0 : index
    %c0_6 = arith.constant 0 : index
    %6 = vector.load %arg5[%c0_5, %c0_6] : memref<16x32xf32, #tpu.memory_space<vmem>>, vector<16x32xf32>
    tpu.vector_store %arg5[%c0_5, %c0_6], %5 {strides = array<i32>} : memref<16x32xf32, #tpu.memory_space<vmem>>, vector<16x32xf32>,
    return
  }
  func.func @transform_0(%arg0: i32, %arg1: i32) -> (i32, i32) {
    %c0_i32 = arith.constant 0 : i32
    %c0_i32_0 = arith.constant 0 : i32
    return %arg0, %c0_i32 : i32, i32
  }
  func.func @transform_1(%arg0: i32, %arg1: i32) -> (i32, i32) {
    %c0_i32 = arith.constant 0 : i32
    %c0_i32_0 = arith.constant 0 : i32
    return %c0_i32, %arg1 : i32, i32
  }
  func.func @transform_2(%arg0: i32, %arg1: i32) -> (i32, i32) {
    %c0_i32 = arith.constant 0 : i32
    %c0_i32_0 = arith.constant 0 : i32
    return %c0_i32, %arg1 : i32, i32
  }
  func.func @transform_3(%arg0: i32, %arg1: i32) -> (i32, i32) {
    %c0_i32 = arith.constant 0 : i32
    return %arg0, %arg1 : i32, i32
  }
}

</mosaic_0001>

<bundles_post_ra>
// kernel: self_attention.3
= control target key start
LH: loop header
LB: loop body
LE: loop exit
PB: predicated region body
PF: predicated region fallthrough
CT: control target
= control target key end

     0   :  { %vm27_vm0 = vcmask 261120   ;;  %vm109_vm1 = vcmask 785408   ;;  %s191_s1 = inlined_call_operand.vmem [shape: f32[32,96], index: 1, kind: input, shape index: {}]   ;;  %s192_s0 = inlined_call_operand.vmem [shape: f32[16,32], index: 0, kind: input, shape index: {}]   ;;  %s193_s2 = inlined_call_operand.vmem [shape: f32[1,96], index: 2, kind: input, shape index: {}]   ;;  %s194_s3 = inlined_call_operand.vmem [shape: f32[16,96], index: 3, kind: output, shape index: {}]  }
   0x1   :  { %v16_v0 = vld [vmem:[%s191_s1] sm:$0xff]  ;;  %v17_v1 = vld [vmem:[%s191_s1 + $0x8] sm:$0xff]  ;;  %v18_v2 = vld [vmem:[%s191_s1 + $0x10] sm:$0xff] }
   0x2   :  { %v136_v3 = vpack.c.bf16 %v17_v1, %v16_v0  ;;  %v19_v4 = vld [vmem:[%s191_s1 + $0x18] sm:$0xff]  ;;  %v14_v5 = vld [vmem:[%s192_s0] sm:$0xff]  ;;  %v15_v7 = vld [vmem:[%s192_s0 + $0x8] sm:$0xff] }
   0x3   :  { %v140_v6 = vpack.c.bf16 %v19_v4, %v18_v2  ;;  %133 = vmatprep.mubr.msk.f32.mxu0 %vm27_vm0, %v14_v5  ;;  %v116_v8 = vld [vmem:[%s193_s2] ss:$0 sm:$0xff] }
   0x4   :  { %137 = vmatprep.subr.bf16.mxu0 %v136_v3 }
   0x5   :  { %139 = vmatpush3.bf16.msra.mxu0 %v136_v3 }
   0x6   :  { %141 = vmatprep.subr.bf16.mxu0 %v140_v6 }
   0x9   :  { %143 = vmatpush3.bf16.msra.mxu0 %v140_v6 }
   0xc   :  { %134 = vmatmul.mubr.msk.f32.vlgmr.msra.gmra.mrb[0].mxu0 %vm27_vm0, %v15_v7 }
  0xdf   :  { %v135_v9 = vpop.f32.mrb[0].mxu0 }
  0xe0   :  { %v106_v10 = vadd.f32 %v135_v9, %v116_v8  ;;  %v100_v11 = vpop.f32.mrb[1].mxu0 }
  0xe1   :  { %v101_v12 = vadd.f32 %v116_v8, %v100_v11 }
  0xe2   :  { %111 = vst.msk [vmem:[%s194_s3 + $0x8] sm:$0xff] %vm109_vm1, %v106_v10 }
  0xe3   :  { %110 = vst.msk [vmem:[%s194_s3] sm:$0xff] %vm109_vm1, %v101_v12 }

// kernel: self_attention.5
= control target key start
LH: loop header
LB: loop body
LE: loop exit
PB: predicated region body
PF: predicated region fallthrough
CT: control target
= control target key end

     0   :  { %vm28_vm0 = vcmask 261120   ;;  %s243_s0 = inlined_call_operand.vmem [shape: f32[16,32], index: 0, kind: input, shape index: {}]   ;;  %s244_s1 = inlined_call_operand.vmem [shape: f32[32,32], index: 1, kind: input, shape index: {}]   ;;  %s245_s2 = inlined_call_operand.vmem [shape: f32[1,32], index: 2, kind: input, shape index: {}]   ;;  %s246_s3 = inlined_call_operand.hbm [shape: f32[16,32], index: 3, kind: output, shape index: {}]  }
   0x1   :  { %v17_v0 = vld [vmem:[%s244_s1] sm:$0xff]  ;;  %v18_v1 = vld [vmem:[%s244_s1 + $0x8] sm:$0xff]  ;;  %v19_v2 = vld [vmem:[%s244_s1 + $0x10] sm:$0xff] }
   0x2   :  { %v148_v3 = vpack.c.bf16 %v18_v1, %v17_v0  ;;  %v20_v4 = vld [vmem:[%s244_s1 + $0x18] sm:$0xff]  ;;  %v15_v5 = vld [vmem:[%s243_s0] sm:$0xff] }
   0x3   :  { %v152_v6 = vpack.c.bf16 %v20_v4, %v19_v2  ;;  %145 = vmatprep.mubr.msk.f32.mxu0 %vm28_vm0, %v15_v5 }
   0x4   :  { %8 = vsyncpa [#allocation3], 0  ;;  %149 = vmatprep.subr.bf16.mxu0 %v148_v3  ;;  %v16_v7 = vld [vmem:[%s243_s0 + $0x8] sm:$0xff]  ;;  %v128_v8 = vld [vmem:[%s245_s2] ss:$0 sm:$0xff]  ;;  %s183_s25 = smov [#allocation2]  }
   0x5   :  { %151 = vmatpush3.bf16.msra.mxu0 %v148_v3  ;;  %s117_s26 = sshll.u32 %s183_s25, 4  ;;  %s118_s26 = int_to_ptr.vmem [resolvable:$true] %s117_s26 }
   0x6   :  { %153 = vmatprep.subr.bf16.mxu0 %v152_v6  ;;  %s159_s27 = scalar_lea.vmem %s118_s26, 256  ;;  %p164_p1 = scmp.lt.s32.totalorder %s118_s26, %s118_s26 }
   0x7   :  { %p160_p0 = scmp.ne.s32.totalorder %s118_s26, %s159_s27  ;;  %p165_p2 = scmp.lt.s32.totalorder %s159_s27, %s159_s27 }
   0x9   :  { %155 = vmatpush3.bf16.msra.mxu0 %v152_v6  ;;  %p166_p3 = por %p165_p2, %p164_p1 }
   0xb   :  { %p167_p4 = pnand %p166_p3, %p160_p0 }
   0xc   :  { %146 = vmatmul.mubr.msk.f32.vlgmr.msra.gmra.mrb[0].mxu0 %vm28_vm0, %v16_v7 }
  0xdf   :  { %v147_v9 = vpop.f32.mrb[0].mxu0 }
  0xe0   :  { %v107_v10 = vadd.f32 %v147_v9, %v128_v8  ;;  %v101_v11 = vpop.f32.mrb[1].mxu0 }
  0xe1   :  { %v102_v12 = vadd.f32 %v128_v8, %v101_v11 }
  0xe2   :  { %111 = vst.msk [vmem:[#allocation2 + $0x8] sm:$0xff] %vm28_vm0, %v107_v10 }
  0xe3   :  { %110 = vst.msk [vmem:[#allocation2] sm:$0xff] %vm28_vm0, %v102_v12 }
  0xe4   :  { %170 = shalt.err (!%p167_p4)
}
  0xe5   :  { %s171_s28 = scalar_lea.hbm %s246_s3, 256 }
  0xe6   :  { %p172_p5 = scmp.ne.s32.totalorder %s246_s3, %s171_s28  ;;  %p175_p6 = scmp.lt.u32.totalorder %s171_s28, %s246_s3 }
  0xe8   :  { %p177_p7 = pnand %p175_p6, %p172_p5 }
  0xea   :  { %180 = shalt.err (!%p177_p7)
}
  0xeb   :  { %s184_s6 = smov 128   ;;  %s185_s7 = smov 8  }
  0xec   :  { %123 = dma.vmem_to_hbm [thread:$0]  %s118_s26, 256, %s246_s3, [#allocation3], %s184_s6, %s184_s6, %s185_s7  }
  0xed   :  { %181 = dma.done.wait [#allocation3], 256  }
  0xee   :  { %182 = vsyncadd [#allocation3], 4294967040 }
  0xef   :  { %127 = vsyncpa [#allocation3], 1 }

// kernel: self_attention.4
= control target key start
LH: loop header
LB: loop body
LE: loop exit
PB: predicated region body
PF: predicated region fallthrough
CT: control target
= control target key end

     0   :  { %s688_s12 = smov 0   ;;  %s690_s13 = smov 0   ;;  %s745_s0 = inlined_call_operand.vmem [shape: f32[8,8,8], index: 0, kind: input, shape index: {}]   ;;  %s746_s1 = inlined_call_operand.vmem [shape: f32[8,8,8], index: 1, kind: input, shape index: {}]   ;;  %s747_s2 = inlined_call_operand.vmem [shape: f32[8,8,8], index: 2, kind: input, shape index: {}]   ;;  %s748_s3 = inlined_call_operand.vmem [shape: f32[8,8,8], index: 3, kind: output, shape index: {}]  }
   0x1   :  { %s692_s14 = smov 0  }
   0x2 LB: > { %s32_s15 = sadd.s32 1, %s658_s13  ;;  %p580_p0 = scmp.ge.s32.totalorder %s662_s14, 1  ;;  %s662_s14 = sphi %s692_s14, %s13_s14   ;;  %s658_s13 = sphi %s690_s13, %s750_s13   ;;  %s654_s12 = sphi %s688_s12, %s749_s12  }
   0x3   : > { %p34_p1 = scmp.ge.s32.totalorder %s32_s15, 8  ;;  %p190_p2 = scmp.lt.s32.totalorder %s662_s14, 9 }
   0x5   : > { %s752_s15 = smov (%p34_p1, %s32_s15), 0  ;;  %p191_p3 = pnand %p580_p0, %p190_p2 }
   0x6   : > { %p232_p4 = scmp.lt.s32.totalorder (!%p191_p3), %s654_s12, 7  ;;  %vm267_vm0 = vcmask (!%p191_p3), 64512   ;;  %v664_v0 = vmov (!%p191_p3), 0.0   ;;  %vm665_vm1 = vmmov (!%p191_p3), 0   ;;  %vm264_vm2 = vcmask (!%p191_p3), 7168  }
   0x7   : > { %194 = sbr.rel (%p191_p3) target bundleno = 816 (0x330), region = 32  ;;  %594 = vmatprep.subr.mxu0 (!%p191_p3), %v664_v0  ;;  %268 = vst.msk [vmem:[#allocation4] sm:$0xff] (!%p191_p3), %vm267_vm0, %v664_v0  ;;  %596 = vmatprep.mubr.msk.f32.mxu0 (!%p191_p3), %vm665_vm1, %v664_v0  ;;  %v666_v3 = vmov (!%p191_p3), -1e+30   ;;  %v667_v7 = vmov (!%p191_p3), 0  }
   0x8   : > { %599 = vmatprep.subr.mxu1 (!%p191_p3), %v664_v0  ;;  %601 = vmatprep.mubr.msk.f32.mxu1 (!%p191_p3), %vm665_vm1, %v664_v0  ;;  %265 = vst.msk [vmem:[#allocation2] sm:$0xff] (!%p191_p3), %vm264_vm2, %v666_v3  ;;  %266 = vst.msk [vmem:[#allocation3] sm:$0xff] (!%p191_p3), %vm264_vm2, %v664_v0 }
   0x9   : > { %632 = vset.pattern.permute.xlu0 (!%p191_p3), %v667_v7  ;;  %633 = vset.pattern.permute.xlu1 (!%p191_p3), %v667_v7 }
   0xe   : > { %s754_s12 = smov (!%p232_p4, %s654_s12), 7  ;;  %v372_v26 = vld [vmem:[#allocation4] sm:$0xff] }
   0xf   : > { %s707_s16 = sshll.u32 %s754_s12, 3  ;;  %v348_v8 = vld [vmem:[#allocation2] sm:$0xff]  ;;  %v364_v20 = vld [vmem:[#allocation3] sm:$0xff] }
  0x10   : > { %s245_s19 = scalar_lea.vmem %s746_s1, %s707_s16  ;;  %s238_s22 = scalar_lea.vmem %s745_s0, %s707_s16 }
  0x11   : > { %v270_v1 = vld [vmem:[%s245_s19] sm:$0xff]  ;;  %s252_s25 = scalar_lea.vmem %s747_s2, %s707_s16  ;;  %s259_s28 = scalar_lea.vmem %s748_s3, %s707_s16 }
  0x12   : > { %595 = vmatpush3.xpose.msk.msra.mxu0 %vm267_vm0, %v270_v1  ;;  %v269_v2 = vld [vmem:[%s238_s22] sm:$0xff] }
  0x13   : > { %v379_v12 = vld [vmem:[%s252_s25] sm:$0xff] }
  0x14   : > { %600 = vmatpush3.msra.mxu1 %v379_v12 }
  0x15   : > { %597 = vmatmul.mubr.msk.f32.vlgmr.msra.gmra.mrb[0].mxu0 %vm267_vm0, %v269_v2 }
  0xe8   : > { %v344_v4 = vpop.f32.mrb[0].mxu0 }
  0xe9   : > { %v598_v5 = vpop.f32.mrb[1].mxu0  ;;  %v349_v6 = vsel %vm267_vm0, %v344_v4, -inf }
  0xea   : > { %350 = vmax.xlane.f32.xlu0 %v349_v6 }
 0x177   : > { %v351_v9 = vpop.xlane.xlu0 %350 }
 0x178   : > { %v352_v10 = vmax.f32 %v348_v8, %v351_v9 }
 0x17a   : > { %v353_v11 = vsub.f32 %v348_v8, %v352_v10  ;;  %455 = vst.msk [vmem:[#allocation2] sm:$0xff] %vm264_vm2, %v352_v10  ;;  %358 = vperm.xlu0 %632, %v352_v10  }
 0x17c   : > { %v354_v18 = vmul.f32 1.442695, %v353_v11 }
 0x1f9   : > { %v359_v13 = vpop.permute.xlu0 %358 }
 0x1fa   : > { %v361_v14 = vsub.f32 %v344_v4, %v359_v13 }
 0x1fc   : > { %v362_v15 = vmul.f32 1.442695, %v361_v14 }
 0x1fe   : > { %634 = vpow2.f32 %v362_v15 }
 0x1ff   : > { %636 = vpow2.f32 %v354_v18 }
 0x208   : > { %v635_v16 = vpop.eup %634 }
 0x209   : > { %602 = vmatmul.mubr.msk.f32.vlgmr.msra.gmra.mrb[0].mxu1 %vm267_vm0, %v635_v16  ;;  %v366_v17 = vsel %vm267_vm0, %v635_v16, 0.0  ;;  %v637_v19 = vpop.eup %636 }
 0x20a   : > { %367 = vadd.xlane.f32.xlu1 %v366_v17  ;;  %v365_v21 = vmul.f32 %v637_v19, %v364_v20 }
 0x21b   : > { %375 = vperm.xlu1 %633, %v637_v19  }
 0x297   : > { %v368_v22 = vpop.xlane.xlu1 %367 }
 0x298   : > { %v369_v23 = vadd.f32 %v368_v22, %v365_v21 }
 0x29a   : > { %371 = vst.msk [vmem:[#allocation3] sm:$0xff] %vm264_vm2, %v369_v23 }
 0x29b   : > { %v376_v27 = vpop.permute.xlu1 %375 }
 0x29c   : > { %v378_v28 = vmul.f32 %v376_v27, %v372_v26 }
 0x2a1   : > { %v459_v24 = vld [vmem:[#allocation3] sm:$0xff] }
 0x2a2   : > { %638 = vrcp.f32 %v459_v24 }
 0x2ac   : > { %v639_v25 = vpop.eup %638 }
 0x2ad   : > { %464 = vperm.xlu1 %633, %v639_v25  }
 0x2dc   : > { %v449_v29 = vpop.f32.mrb[0].mxu1 }
 0x2dd   : > { %v453_v30 = vadd.f32 %v449_v29, %v378_v28  ;;  %v603_v31 = vpop.f32.mrb[1].mxu1 }
 0x2df   : > { %454 = vst.msk [vmem:[#allocation4] sm:$0xff] %vm267_vm0, %v453_v30 }
 0x2e6   : > { %v461_v32 = vld [vmem:[#allocation4] sm:$0xff] }
 0x32c   : > { %v465_v33 = vpop.permute.xlu1 %464 }
 0x32d   : > { %v467_v34 = vmul.f32 %v465_v33, %v461_v32 }
 0x32f   : > { %468 = vst.msk [vmem:[%s259_s28] sm:$0xff] %vm267_vm0, %v467_v34 }
 0x330 PF: > { %s13_s14 = sadd.s32 1, %s662_s14   ;;  %s749_s12 = smov %s658_s13 }
 0x331   : > { %p10_p5 = scmp.ge.s32.totalorder %s13_s14, 10   ;;  %s750_s13 = smov %s752_s15 }
 0x333   :  { %12 = sbr.rel (!%p10_p5) target bundleno = 2 (0x2), region = 76 }

</bundles_post_ra>
